<compile_context>
chip_gen: v7x
topology: tpu7x:2x2x1
jax: 0.10.0
libtpu: 0.0.40
codegen_flags: <defaults>
</compile_context>

<pallas_src>
import jax
import jax.numpy as jnp
from jax.experimental import pallas as pl
from jax.experimental.pallas import tpu as pltpu


def _round_up(x: int, m: int) -> int:
    return (x + m - 1) // m * m


def _cdiv(a: int, b: int) -> int:
    return -(-a // b)


def _linear_kernel(x_ref, w_ref, b_ref, o_ref):
    # f32 operands straight off HBM; MXU matmul with f32 accumulate, f32 bias add,
    # store only the real N output columns (block last dim == full array dim).
    acc = jnp.dot(x_ref[...], w_ref[...], preferred_element_type=jnp.float32)
    o_ref[...] = (acc + b_ref[...]).astype(o_ref.dtype)


def linear_pallas(x2d, w_t, b_row, *, tm_max: int = 1024):
    """x2d: [M, K] f32, w_t: [K, N] f32, b_row: [1, N] f32 -> [M, N] f32."""
    M, K = x2d.shape
    _, N = w_t.shape

    # Pad M only to the 8-sublane granule, then pick a (v7x-friendly, even) tile count that
    # divides the padded extent with at most ~8*n slack rows (never tm-1 like before).
    Mp = _round_up(max(M, 8), 8)
    n_tiles = _cdiv(Mp, tm_max)
    if Mp >= 512:                 # tiles stay >=256 rows: worth splitting for the 2 v7x TCs
        n_tiles = max(n_tiles, 2)
    if n_tiles > 1 and n_tiles % 2:
        n_tiles += 1              # even tile count splits cleanly across 2 TensorCores
    tm = _round_up(_cdiv(Mp, n_tiles), 8)
    Mp = tm * n_tiles
    if Mp != M:
        x2d = jnp.pad(x2d, ((0, Mp - M), (0, 0)))  # inside jit; no-op when M is 8-aligned

    out = pl.pallas_call(
        _linear_kernel,
        out_shape=jax.ShapeDtypeStruct((Mp, N), jnp.float32),
        grid_spec=pl.GridSpec(
            grid=(n_tiles,),
            in_specs=[
                pl.BlockSpec((tm, K), lambda i: (i, 0)),  # activations: tiled over M
                pl.BlockSpec((K, N), lambda i: (0, 0)),   # weight: resident across M tiles
                pl.BlockSpec((1, N), lambda i: (0, 0)),   # bias: resident across M tiles
            ],
            out_specs=pl.BlockSpec((tm, N), lambda i: (i, 0)),
        ),
        compiler_params=pltpu.CompilerParams(
            dimension_semantics=("parallel",),  # shard M tiles across TCs (v7x megacore)
            vmem_limit_bytes=32 << 20,          # <= v7x scoped default; working set ~1.5 MiB
        ),
        cost_estimate=pl.CostEstimate(
            flops=2 * Mp * K * N,
            transcendentals=0,
            bytes_accessed=Mp * K * 4 + K * N * 4 + N * 4 + Mp * N * 4,
        ),
    )(x2d, w_t, b_row)

    return out if Mp == M else out[:M]


@jax.jit
def _tagged_linear_forward(x, w_t, b_row):
    # Whole forward under one jit: reshape / pad / pallas_call / slice / reshape fuse and
    # dispatch once.
    B, S, H = x.shape
    N = w_t.shape[1]
    y2d = linear_pallas(x.reshape(B * S, H), w_t, b_row)
    return y2d.reshape(B, S, N)


class CoreLinear:
    """The wrapped core: equivalent of nn.Linear(in_features, out_features, bias=True)."""

    def __init__(self, in_features, out_features, key):
        kw, kb = jax.random.split(key)
        bound = 1.0 / (in_features ** 0.5)
        # PyTorch stores weight as [out, in]; keep that convention for reference math.
        self.weight = jax.random.uniform(
            kw, (out_features, in_features), jnp.float32, -bound, bound
        )
        self.bias = jax.random.uniform(kb, (out_features,), jnp.float32, -bound, bound)

        self.in_features = in_features
        self.out_features = out_features

        # Hoisted, done once: transpose to [in, out] and reshape bias to a 2-D row.
        # No dtype change and no column padding -> exact f32 semantics, minimal HBM bytes.
        self.w_t = jnp.asarray(self.weight.T)            # [in, out] f32
        self.b_row = self.bias.reshape(1, out_features)  # [1, out] f32

    def __call__(self, x):
        # x: [B, S, H_in] -> [B, S, H_out]
        return _tagged_linear_forward(x, self.w_t, self.b_row)


class ModuleTag:
    """Exact semantics of the PyTorch ModuleTag: pure delegation to `core`."""

    def __init__(self, core):
        self.core = core

    def __call__(self, *args, **kwargs):
        return self.core(*args, **kwargs)


if __name__ == "__main__":
    key = jax.random.PRNGKey(0)
    k_x, k_core = jax.random.split(key)

    B, S, H_IN, H_OUT = 2, 8, 32, 64
    x = jax.random.normal(k_x, (B, S, H_IN), dtype=jnp.float32)

    core = CoreLinear(H_IN, H_OUT, k_core)
    tagged = ModuleTag(core)

    y = tagged(x)
    jax.block_until_ready(y)
    assert y.shape == (B, S, H_OUT)

    # f32 reference of the wrapped nn.Linear (highest-precision einsum).  The kernel now runs
    # f32 end-to-end, so only MXU f32 pass decomposition noise remains.
    y_ref = (
        jnp.einsum("bsh,oh->bso", x, core.weight, precision=jax.lax.Precision.HIGHEST)
        + core.bias
    )
    assert jnp.allclose(y, y_ref, atol=2e-3, rtol=2e-3)
    assert float(jnp.max(jnp.abs(y - y_ref))) < 2e-3

    print("KERNEL_OK")
</pallas_src>

<mosaic_0001>
module attributes {stable_mosaic.version = 11 : i64} {
  func.func @_linear_kernel(%arg0: i32, %arg1: memref<16x32xf32, #tpu.memory_space<vmem>>, %arg2: memref<32x64xf32, #tpu.memory_space<vmem>>, %arg3: memref<1x64xf32, #tpu.memory_space<vmem>>, %arg4: memref<16x64xf32, #tpu.memory_space<vmem>>) attributes {dimension_semantics = [#tpu.dimension_semantics<parallel>], iteration_bounds = array<i64: 1>, scalar_prefetch = 0 : i64, scratch_operands = 0 : i64, tpu.core_type = #tpu.core_type<tc>, window_params = [{transform_indices = @transform_0, window_bounds = array<i64: 16, 32>}, {pipeline_mode = #tpu.pipeline_mode<synchronous>, transform_indices = @transform_1, window_bounds = array<i64: 32, 64>}, {pipeline_mode = #tpu.pipeline_mode<synchronous>, transform_indices = @transform_2, window_bounds = array<i64: 1, 64>}, {transform_indices = @transform_3, window_bounds = array<i64: 16, 64>}]} {
    %c0 = arith.constant 0 : index
    %c0_0 = arith.constant 0 : index
    %0 = vector.load %arg1[%c0, %c0_0] : memref<16x32xf32, #tpu.memory_space<vmem>>, vector<16x32xf32>
    %c0_1 = arith.constant 0 : index
    %c0_2 = arith.constant 0 : index
    %1 = vector.load %arg2[%c0_1, %c0_2] : memref<32x64xf32, #tpu.memory_space<vmem>>, vector<32x64xf32>
    %cst = arith.constant dense<0.000000e+00> : vector<16x64xf32>
    %2 = tpu.matmul %0, %1, %cst {dimension_numbers = #tpu.dot_dimension_numbers<[1], [0], [0], [1], [0, 0, 1, 1], [], []>} : vector<16x32xf32>, vector<32x64xf32>, vector<16x64xf32> -> vector<16x64xf32>
    %c0_3 = arith.constant 0 : index
    %c0_4 = arith.constant 0 : index
    %3 = vector.load %arg3[%c0_3, %c0_4] : memref<1x64xf32, #tpu.memory_space<vmem>>, vector<1x64xf32>
    %4 = vector.broadcast %3 : vector<1x64xf32> to vector<16x64xf32>
    %5 = arith.addf %2, %4 : vector<16x64xf32>
    %c0_5 = arith.constant 0 : index
    %c0_6 = arith.constant 0 : index
    %6 = vector.load %arg4[%c0_5, %c0_6] : memref<16x64xf32, #tpu.memory_space<vmem>>, vector<16x64xf32>
    tpu.vector_store %arg4[%c0_5, %c0_6], %5 {strides = array<i32>} : memref<16x64xf32, #tpu.memory_space<vmem>>, vector<16x64xf32>,
    return
  }
  func.func @transform_0(%arg0: i32) -> (i32, i32) {
    %c0_i32 = arith.constant 0 : i32
    %c0_i32_0 = arith.constant 0 : i32
    return %arg0, %c0_i32 : i32, i32
  }
  func.func @transform_1(%arg0: i32) -> (i32, i32) {
    %c0_i32 = arith.constant 0 : i32
    %c0_i32_0 = arith.constant 0 : i32
    %c0_i32_1 = arith.constant 0 : i32
    return %c0_i32, %c0_i32_0 : i32, i32
  }
  func.func @transform_2(%arg0: i32) -> (i32, i32) {
    %c0_i32 = arith.constant 0 : i32
    %c0_i32_0 = arith.constant 0 : i32
    %c0_i32_1 = arith.constant 0 : i32
    return %c0_i32, %c0_i32_0 : i32, i32
  }
  func.func @transform_3(%arg0: i32) -> (i32, i32) {
    %c0_i32 = arith.constant 0 : i32
    %c0_i32_0 = arith.constant 0 : i32
    return %arg0, %c0_i32 : i32, i32
  }
}

</mosaic_0001>

<bundles_post_ra>
// kernel: _tagged_linear_forward.1
= control target key start
LH: loop header
LB: loop body
LE: loop exit
PB: predicated region body
PF: predicated region fallthrough
CT: control target
= control target key end

     0   :  { %8 = vsyncpa [#allocation3], 0  ;;  %s337_s0 = inlined_call_operand.hbm [shape: f32[16,32], index: 0, kind: input, shape index: {}]   ;;  %s338_s1 = inlined_call_operand.hbm [shape: f32[32,64], index: 1, kind: input, shape index: {}]   ;;  %s339_s2 = inlined_call_operand.vmem [shape: f32[1,64], index: 2, kind: input, shape index: {}]   ;;  %s340_s3 = inlined_call_operand.hbm [shape: f32[16,64], index: 3, kind: output, shape index: {}]  }
   0x1   :  { %9 = vsyncpa [#allocation6], 0 }
   0x2   :  { %10 = vsyncpa [#allocation4], 0  ;;  %s264_s12 = smov [#allocation2]   ;;  %s192_s16 = scalar_lea.hbm %s337_s0, 256 }
   0x3   :  { %s16_s13 = sshll.u32 %s264_s12, 4  ;;  %p193_p0 = scmp.ne.s32.totalorder %s337_s0, %s192_s16  ;;  %s17_s13 = int_to_ptr.vmem [resolvable:$true] %s16_s13 }
   0x4   :  { %p196_p1 = scmp.lt.u32.totalorder %s192_s16, %s337_s0 }
   0x6   :  { %p198_p2 = pnand %p196_p1, %p193_p0 }
   0x8   :  { %201 = shalt.err (!%p198_p2)
}
   0x9   :  { %s202_s21 = scalar_lea.vmem %s17_s13, 256  ;;  %p207_p4 = scmp.lt.s32.totalorder %s17_s13, %s17_s13 }
   0xa   :  { %p203_p3 = scmp.ne.s32.totalorder %s17_s13, %s202_s21  ;;  %p208_p5 = scmp.lt.s32.totalorder %s202_s21, %s202_s21 }
   0xc   :  { %p209_p6 = por %p208_p5, %p207_p4 }
   0xe   :  { %p210_p7 = pnand %p209_p6, %p203_p3 }
  0x10   :  { %213 = shalt.err (!%p210_p7)
}
  0x11   :  { %s265_s22 = smov 128   ;;  %s266_s23 = smov 8  }
  0x12   :  { %22 = dma.hbm_to_vmem [thread:$0]  %s337_s0, 256, %s17_s13, [#allocation3], %s265_s22, %s265_s22, %s266_s23  }
  0x13   :  { %s267_s26 = smov [#allocation5]   ;;  %s214_s30 = scalar_lea.hbm %s338_s1, 512 }
  0x14   :  { %s28_s27 = sshll.u32 %s267_s26, 4  ;;  %p215_p8 = scmp.ne.s32.totalorder %s338_s1, %s214_s30  ;;  %s29_s27 = int_to_ptr.vmem [resolvable:$true] %s28_s27 }
  0x15   :  { %p218_p9 = scmp.lt.u32.totalorder %s214_s30, %s338_s1 }
  0x17   :  { %p220_p10 = pnand %p218_p9, %p215_p8 }
  0x19   :  { %223 = shalt.err (!%p220_p10)
}
  0x1a   :  { %s224_s8 = scalar_lea.vmem %s29_s27, 512  ;;  %p229_p12 = scmp.lt.s32.totalorder %s29_s27, %s29_s27 }
  0x1b   :  { %p225_p11 = scmp.ne.s32.totalorder %s29_s27, %s224_s8  ;;  %p230_p13 = scmp.lt.s32.totalorder %s224_s8, %s224_s8 }
  0x1d   :  { %p231_p0 = por %p230_p13, %p229_p12 }
  0x1f   :  { %p232_p1 = pnand %p231_p0, %p225_p11 }
  0x21   :  { %235 = shalt.err (!%p232_p1)
}
  0x22   :  { %34 = dma.hbm_to_vmem [thread:$0]  %s338_s1, 512, %s29_s27, [#allocation6], %s265_s22, %s265_s22, %s266_s23  }
  0x23   :  { %258 = dma.done.wait [#allocation3], 256  }
  0x24   :  { %259 = vsyncadd [#allocation3], 4294967040 }
  0x25   :  { %260 = dma.done.wait [#allocation6], 512  }
  0x26   :  { %261 = vsyncadd [#allocation6], 4294966784  ;;  %vm56_vm0 = vcmask 261120   ;;  %v45_v0 = vld [vmem:[#allocation5] sm:$0xff]  ;;  %v46_v1 = vld [vmem:[#allocation5 + $0x8] sm:$0xff]  ;;  %s268_s11 = smov [#allocation7]  }
  0x27   :  { %v47_v2 = vld [vmem:[#allocation5 + $0x10] sm:$0xff]  ;;  %v179_v3 = vpack.c.bf16 %v46_v1, %v45_v0  ;;  %v48_v4 = vld [vmem:[#allocation5 + $0x18] sm:$0xff]  ;;  %s146_s12 = sshll.u32 %s268_s11, 4  ;;  %vm138_vm1 = vcmask 523264   ;;  %s147_s12 = int_to_ptr.vmem [resolvable:$true] %s146_s12 }
  0x28   :  { %v43_v5 = vld [vmem:[#allocation2] sm:$0xff]  ;;  %v183_v6 = vpack.c.bf16 %v48_v4, %v47_v2  ;;  %v44_v7 = vld [vmem:[#allocation2 + $0x8] sm:$0xff]  ;;  %s236_s13 = scalar_lea.vmem %s147_s12, 256  ;;  %p241_p3 = scmp.lt.s32.totalorder %s147_s12, %s147_s12 }
  0x29   :  { %176 = vmatprep.mubr.msk.f32.mxu0 %vm56_vm0, %v43_v5  ;;  %180 = vmatprep.subr.bf16.mxu0 %v179_v3  ;;  %v159_v8 = vld [vmem:[%s339_s2] ss:$0 sm:$0xff]  ;;  %p237_p2 = scmp.ne.s32.totalorder %s147_s12, %s236_s13  ;;  %p242_p4 = scmp.lt.s32.totalorder %s236_s13, %s236_s13 }
  0x2a   :  { %182 = vmatpush3.bf16.msra.mxu0 %v179_v3 }
  0x2b   :  { %184 = vmatprep.subr.bf16.mxu0 %v183_v6  ;;  %p243_p5 = por %p242_p4, %p241_p3 }
  0x2d   :  { %p244_p6 = pnand %p243_p5, %p237_p2 }
  0x2e   :  { %186 = vmatpush3.bf16.msra.mxu0 %v183_v6 }
  0x31   :  { %177 = vmatmul.mubr.msk.f32.vlgmr.msra.gmra.mrb[0].mxu0 %vm56_vm0, %v44_v7 }
 0x104   :  { %v178_v9 = vpop.f32.mrb[0].mxu0 }
 0x105   :  { %v135_v10 = vadd.f32 %v178_v9, %v159_v8  ;;  %v129_v11 = vpop.f32.mrb[1].mxu0 }
 0x106   :  { %v130_v12 = vadd.f32 %v159_v8, %v129_v11 }
 0x107   :  { %140 = vst.msk [vmem:[#allocation7 + $0x8] sm:$0xff] %vm138_vm1, %v135_v10 }
 0x108   :  { %139 = vst.msk [vmem:[#allocation7] sm:$0xff] %vm138_vm1, %v130_v12 }
 0x109   :  { %247 = shalt.err (!%p244_p6)
}
 0x10a   :  { %s248_s2 = scalar_lea.hbm %s340_s3, 256 }
 0x10b   :  { %p249_p7 = scmp.ne.s32.totalorder %s340_s3, %s248_s2  ;;  %p252_p8 = scmp.lt.u32.totalorder %s248_s2, %s340_s3 }
 0x10d   :  { %p254_p9 = pnand %p252_p8, %p249_p7 }
 0x10f   :  { %257 = shalt.err (!%p254_p9)
}
 0x110   :  { %152 = dma.vmem_to_hbm [thread:$0]  %s147_s12, 256, %s340_s3, [#allocation4], %s265_s22, %s265_s22, %s266_s23  }
 0x111   :  { %262 = dma.done.wait [#allocation4], 256  }
 0x112   :  { %263 = vsyncadd [#allocation4], 4294967040 }
 0x113   :  { %156 = vsyncpa [#allocation3], 1 }
 0x114   :  { %157 = vsyncpa [#allocation6], 1 }
 0x115   :  { %158 = vsyncpa [#allocation4], 1 }

</bundles_post_ra>
